<compile_context>
chip_gen: v5e
topology: v5e:2x2
jax: 0.10.0
libtpu: 0.0.40
codegen_flags: <defaults>
</compile_context>

<pallas_src>
import jax
import jax.numpy as jnp
from jax.experimental import pallas as pl
from jax.experimental.pallas import tpu as pltpu

NEG_SLOPE = 0.01  # nn.LeakyReLU() default negative_slope


def _leaky_relu(x):
    return jnp.where(x >= 0, x, NEG_SLOPE * x)


def dnnet_kernel(x_ref, w0_ref, wh_ref, b_ref, o_ref):
    # x_ref : (IN, TB)   input tile, batch on the lane axis (f32)
    # w0_ref: (H, IN)    first-layer weight, PyTorch (out, in) layout
    # wh_ref: (5, H, H)  stacked hidden-layer weights, PyTorch layout
    # b_ref : (H, 8)     f32 pack: col k (k=0..5) = bias of layer k,
    #                    b_ref[0, 6] = scalar bias of the final layer,
    #                    col 7       = final-layer weight as a column
    # o_ref : (1, TB)    lane-dense output tile
    wdt = w0_ref.dtype            # MXU operand dtype (f32 or bf16)
    x = x_ref[...]                # (IN, TB) f32
    b = b_ref[...]                # (H, 8)  f32

    # Layer 0: Linear(in, H) -- no activation (matches the Sequential).
    h = jnp.dot(w0_ref[...], x.astype(wdt),
                preferred_element_type=jnp.float32) + b[:, 0:1]

    # Layers 1..5: Linear(H, H) + LeakyReLU (weights stay VMEM-resident).
    for k in range(5):
        z = jnp.dot(wh_ref[k], h.astype(wdt),
                    preferred_element_type=jnp.float32) + b[:, k + 1:k + 2]
        h = _leaky_relu(z)

    # Final Linear(H, 1): broadcast-mul + sublane reduce (VPU/XLU, MXU-free),
    # keeps the output lane-dense.
    w6 = b[:, 7:8]                                              # (H, 1) f32
    y = jnp.sum(h * w6, axis=0, keepdims=True) + b[0:1, 6:7]    # (1, TB)
    o_ref[...] = y.astype(o_ref.dtype)


def dnnet_forward(x, params, *, block_b=128, weight_dtype=jnp.float32):
    """x: (B, in_size) f32.
    params: 7 (W, b) pairs in PyTorch layout: W=(out_features, in_features),
    b=(out_features,).  Returns (B, 1) f32."""
    B, in_size = x.shape
    H = params[0][0].shape[0]

    # ---- pack the 15 parameter tensors into 3 arrays (few, large DMAs) ----
    w0 = params[0][0].astype(weight_dtype)                                   # (H, IN)
    wh = jnp.stack([params[k][0] for k in range(1, 6)], 0).astype(weight_dtype)  # (5,H,H)
    b_hidden = jnp.stack([params[k][1].astype(jnp.float32)
                          for k in range(6)], 1)                             # (H, 6)
    b_last = jnp.zeros((H, 1), jnp.float32).at[0, 0].set(
        params[6][1].astype(jnp.float32).reshape(()))                        # (H, 1)
    w6_col = params[6][0].astype(jnp.float32).reshape(H, 1)                  # (H, 1)
    bpack = jnp.concatenate([b_hidden, b_last, w6_col], axis=1)              # (H, 8)

    # ---- batch tiling: batch on the lane axis, pad to a tile multiple ----
    if B <= block_b:
        tb = B
        Bp = B
    else:
        tb = block_b
        Bp = ((B + tb - 1) // tb) * tb
    x_t = x.astype(jnp.float32).T                                            # (IN, B)
    if Bp != B:
        x_t = jnp.pad(x_t, ((0, 0), (0, Bp - B)))

    out = pl.pallas_call(
        dnnet_kernel,
        out_shape=jax.ShapeDtypeStruct((1, Bp), jnp.float32),
        grid=(Bp // tb,),
        in_specs=[
            pl.BlockSpec((in_size, tb), lambda i: (0, i)),   # x tile: pipelined
            pl.BlockSpec((H, in_size), lambda i: (0, 0)),    # weights: resident
            pl.BlockSpec((5, H, H), lambda i: (0, 0, 0)),
            pl.BlockSpec((H, 8), lambda i: (0, 0)),
        ],
        out_specs=pl.BlockSpec((1, tb), lambda i: (0, i)),    # lane-dense output
        compiler_params=pltpu.CompilerParams(
            dimension_semantics=("parallel",)),               # megacore on v7x
    )(x_t, w0, wh, bpack)

    return out[:, :B].reshape(B, 1)


def init_params(key, in_size, hidden):
    """PyTorch nn.Linear default init: U(-1/sqrt(fan_in), 1/sqrt(fan_in))
    for both W (out, in) and b (out,)."""
    dims = [(hidden, in_size)] + [(hidden, hidden)] * 5 + [(1, hidden)]
    params = []
    for (fan_out, fan_in) in dims:
        key, kw, kb = jax.random.split(key, 3)
        bound = 1.0 / (float(fan_in) ** 0.5)
        w = jax.random.uniform(kw, (fan_out, fan_in), jnp.float32, -bound, bound)
        b = jax.random.uniform(kb, (fan_out,), jnp.float32, -bound, bound)
        params.append((w, b))
    return params


def reference_forward(x, params):
    h = x @ params[0][0].T + params[0][1]
    for (w, b) in params[1:6]:
        h = _leaky_relu(h @ w.T + b)
    return h @ params[6][0].T + params[6][1]


if __name__ == "__main__":
    B, IN_SIZE, HIDDEN = 256, 16, 32   # two batch tiles of 128 -> exercises grid

    key = jax.random.PRNGKey(0)
    key, kx = jax.random.split(key)
    x = jax.random.normal(kx, (B, IN_SIZE), jnp.float32)
    params = init_params(key, IN_SIZE, HIDDEN)

    ref = reference_forward(x, params)

    # f32 weights: tight correctness check.
    out = jax.block_until_ready(dnnet_forward(x, params))
    assert out.shape == (B, 1), out.shape
    assert jnp.allclose(out, ref, atol=1e-4, rtol=1e-4), \
        float(jnp.max(jnp.abs(out - ref)))

    # Odd batch (exercises padding path).
    out_odd = jax.block_until_ready(dnnet_forward(x[:131], params))
    assert out_odd.shape == (131, 1), out_odd.shape
    assert jnp.allclose(out_odd, ref[:131], atol=1e-4, rtol=1e-4), \
        float(jnp.max(jnp.abs(out_odd - ref[:131])))

    # bf16 dot operands (v6e/v7x MXU fast path): looser tolerance.
    out_bf16 = jax.block_until_ready(
        dnnet_forward(x, params, weight_dtype=jnp.bfloat16))
    assert out_bf16.shape == (B, 1), out_bf16.shape
    assert jnp.allclose(out_bf16, ref, atol=5e-2, rtol=5e-2), \
        float(jnp.max(jnp.abs(out_bf16 - ref)))

    print("KERNEL_OK")
</pallas_src>

<mosaic_0001>
module attributes {stable_mosaic.version = 11 : i64} {
  func.func @dnnet_kernel(%arg0: i32, %arg1: memref<16x128xf32, #tpu.memory_space<vmem>>, %arg2: memref<32x16xf32, #tpu.memory_space<vmem>>, %arg3: memref<5x32x32xf32, #tpu.memory_space<vmem>>, %arg4: memref<32x8xf32, #tpu.memory_space<vmem>>, %arg5: memref<1x128xf32, #tpu.memory_space<vmem>>) attributes {dimension_semantics = [#tpu.dimension_semantics<parallel>], iteration_bounds = array<i64: 2>, scalar_prefetch = 0 : i64, scratch_operands = 0 : i64, tpu.core_type = #tpu.core_type<tc>, window_params = [{transform_indices = @transform_0, window_bounds = array<i64: 16, 128>}, {pipeline_mode = #tpu.pipeline_mode<synchronous>, transform_indices = @transform_1, window_bounds = array<i64: 32, 16>}, {pipeline_mode = #tpu.pipeline_mode<synchronous>, transform_indices = @transform_2, window_bounds = array<i64: 5, 32, 32>}, {pipeline_mode = #tpu.pipeline_mode<synchronous>, transform_indices = @transform_3, window_bounds = array<i64: 32, 8>}, {transform_indices = @transform_4, window_bounds = array<i64: 1, 128>}]} {
    %c0 = arith.constant 0 : index
    %c0_0 = arith.constant 0 : index
    %0 = vector.load %arg1[%c0, %c0_0] : memref<16x128xf32, #tpu.memory_space<vmem>>, vector<16x128xf32>
    %c0_1 = arith.constant 0 : index
    %c0_2 = arith.constant 0 : index
    %1 = vector.load %arg4[%c0_1, %c0_2] : memref<32x8xf32, #tpu.memory_space<vmem>>, vector<32x8xf32>
    %c0_3 = arith.constant 0 : index
    %c0_4 = arith.constant 0 : index
    %2 = vector.load %arg2[%c0_3, %c0_4] : memref<32x16xf32, #tpu.memory_space<vmem>>, vector<32x16xf32>
    %cst = arith.constant dense<0.000000e+00> : vector<32x128xf32>
    %3 = tpu.matmul %2, %0, %cst {dimension_numbers = #tpu.dot_dimension_numbers<[1], [0], [0], [1], [0, 0, 1, 1], [], []>} : vector<32x16xf32>, vector<16x128xf32>, vector<32x128xf32> -> vector<32x128xf32>
    %4 = vector.extract_strided_slice %1 {offsets = [0, 0], sizes = [32, 1], strides = [1, 1]} : vector<32x8xf32> to vector<32x1xf32>
    %5 = vector.broadcast %4 : vector<32x1xf32> to vector<32x128xf32>
    %6 = arith.addf %3, %5 : vector<32x128xf32>
    %c0_5 = arith.constant 0 : index
    %c0_6 = arith.constant 0 : index
    %c0_7 = arith.constant 0 : index
    %7 = vector.load %arg3[%c0_5, %c0_6, %c0_7] : memref<5x32x32xf32, #tpu.memory_space<vmem>>, vector<1x32x32xf32>
    %8 = vector.shape_cast %7 : vector<1x32x32xf32> to vector<32x32xf32>
    %cst_8 = arith.constant dense<0.000000e+00> : vector<32x128xf32>
    %9 = tpu.matmul %8, %6, %cst_8 {dimension_numbers = #tpu.dot_dimension_numbers<[1], [0], [0], [1], [0, 0, 1, 1], [], []>} : vector<32x32xf32>, vector<32x128xf32>, vector<32x128xf32> -> vector<32x128xf32>
    %10 = vector.extract_strided_slice %1 {offsets = [0, 1], sizes = [32, 1], strides = [1, 1]} : vector<32x8xf32> to vector<32x1xf32>
    %11 = vector.broadcast %10 : vector<32x1xf32> to vector<32x128xf32>
    %12 = arith.addf %9, %11 : vector<32x128xf32>
    %cst_9 = arith.constant 0.000000e+00 : f32
    %13 = vector.broadcast %cst_9 : f32 to vector<32x128xf32>
    %14 = arith.cmpf oge, %12, %13 : vector<32x128xf32>
    %cst_10 = arith.constant 0.00999999977 : f32
    %15 = vector.broadcast %cst_10 : f32 to vector<32x128xf32>
    %16 = arith.mulf %15, %12 : vector<32x128xf32>
    %17 = arith.select %14, %12, %16 : vector<32x128xi1>, vector<32x128xf32>
    %c1 = arith.constant 1 : index
    %c0_11 = arith.constant 0 : index
    %c0_12 = arith.constant 0 : index
    %18 = vector.load %arg3[%c1, %c0_11, %c0_12] : memref<5x32x32xf32, #tpu.memory_space<vmem>>, vector<1x32x32xf32>
    %19 = vector.shape_cast %18 : vector<1x32x32xf32> to vector<32x32xf32>
    %cst_13 = arith.constant dense<0.000000e+00> : vector<32x128xf32>
    %20 = tpu.matmul %19, %17, %cst_13 {dimension_numbers = #tpu.dot_dimension_numbers<[1], [0], [0], [1], [0, 0, 1, 1], [], []>} : vector<32x32xf32>, vector<32x128xf32>, vector<32x128xf32> -> vector<32x128xf32>
    %21 = vector.extract_strided_slice %1 {offsets = [0, 2], sizes = [32, 1], strides = [1, 1]} : vector<32x8xf32> to vector<32x1xf32>
    %22 = vector.broadcast %21 : vector<32x1xf32> to vector<32x128xf32>
    %23 = arith.addf %20, %22 : vector<32x128xf32>
    %cst_14 = arith.constant 0.000000e+00 : f32
    %24 = vector.broadcast %cst_14 : f32 to vector<32x128xf32>
    %25 = arith.cmpf oge, %23, %24 : vector<32x128xf32>
    %cst_15 = arith.constant 0.00999999977 : f32
    %26 = vector.broadcast %cst_15 : f32 to vector<32x128xf32>
    %27 = arith.mulf %26, %23 : vector<32x128xf32>
    %28 = arith.select %25, %23, %27 : vector<32x128xi1>, vector<32x128xf32>
    %c2 = arith.constant 2 : index
    %c0_16 = arith.constant 0 : index
    %c0_17 = arith.constant 0 : index
    %29 = vector.load %arg3[%c2, %c0_16, %c0_17] : memref<5x32x32xf32, #tpu.memory_space<vmem>>, vector<1x32x32xf32>
    %30 = vector.shape_cast %29 : vector<1x32x32xf32> to vector<32x32xf32>
    %cst_18 = arith.constant dense<0.000000e+00> : vector<32x128xf32>
    %31 = tpu.matmul %30, %28, %cst_18 {dimension_numbers = #tpu.dot_dimension_numbers<[1], [0], [0], [1], [0, 0, 1, 1], [], []>} : vector<32x32xf32>, vector<32x128xf32>, vector<32x128xf32> -> vector<32x128xf32>
    %32 = vector.extract_strided_slice %1 {offsets = [0, 3], sizes = [32, 1], strides = [1, 1]} : vector<32x8xf32> to vector<32x1xf32>
    %33 = vector.broadcast %32 : vector<32x1xf32> to vector<32x128xf32>
    %34 = arith.addf %31, %33 : vector<32x128xf32>
    %cst_19 = arith.constant 0.000000e+00 : f32
    %35 = vector.broadcast %cst_19 : f32 to vector<32x128xf32>
    %36 = arith.cmpf oge, %34, %35 : vector<32x128xf32>
    %cst_20 = arith.constant 0.00999999977 : f32
    %37 = vector.broadcast %cst_20 : f32 to vector<32x128xf32>
    %38 = arith.mulf %37, %34 : vector<32x128xf32>
    %39 = arith.select %36, %34, %38 : vector<32x128xi1>, vector<32x128xf32>
    %c3 = arith.constant 3 : index
    %c0_21 = arith.constant 0 : index
    %c0_22 = arith.constant 0 : index
    %40 = vector.load %arg3[%c3, %c0_21, %c0_22] : memref<5x32x32xf32, #tpu.memory_space<vmem>>, vector<1x32x32xf32>
    %41 = vector.shape_cast %40 : vector<1x32x32xf32> to vector<32x32xf32>
    %cst_23 = arith.constant dense<0.000000e+00> : vector<32x128xf32>
    %42 = tpu.matmul %41, %39, %cst_23 {dimension_numbers = #tpu.dot_dimension_numbers<[1], [0], [0], [1], [0, 0, 1, 1], [], []>} : vector<32x32xf32>, vector<32x128xf32>, vector<32x128xf32> -> vector<32x128xf32>
    %43 = vector.extract_strided_slice %1 {offsets = [0, 4], sizes = [32, 1], strides = [1, 1]} : vector<32x8xf32> to vector<32x1xf32>
    %44 = vector.broadcast %43 : vector<32x1xf32> to vector<32x128xf32>
    %45 = arith.addf %42, %44 : vector<32x128xf32>
    %cst_24 = arith.constant 0.000000e+00 : f32
    %46 = vector.broadcast %cst_24 : f32 to vector<32x128xf32>
    %47 = arith.cmpf oge, %45, %46 : vector<32x128xf32>
    %cst_25 = arith.constant 0.00999999977 : f32
    %48 = vector.broadcast %cst_25 : f32 to vector<32x128xf32>
    %49 = arith.mulf %48, %45 : vector<32x128xf32>
    %50 = arith.select %47, %45, %49 : vector<32x128xi1>, vector<32x128xf32>
    %c4 = arith.constant 4 : index
    %c0_26 = arith.constant 0 : index
    %c0_27 = arith.constant 0 : index
    %51 = vector.load %arg3[%c4, %c0_26, %c0_27] : memref<5x32x32xf32, #tpu.memory_space<vmem>>, vector<1x32x32xf32>
    %52 = vector.shape_cast %51 : vector<1x32x32xf32> to vector<32x32xf32>
    %cst_28 = arith.constant dense<0.000000e+00> : vector<32x128xf32>
    %53 = tpu.matmul %52, %50, %cst_28 {dimension_numbers = #tpu.dot_dimension_numbers<[1], [0], [0], [1], [0, 0, 1, 1], [], []>} : vector<32x32xf32>, vector<32x128xf32>, vector<32x128xf32> -> vector<32x128xf32>
    %54 = vector.extract_strided_slice %1 {offsets = [0, 5], sizes = [32, 1], strides = [1, 1]} : vector<32x8xf32> to vector<32x1xf32>
    %55 = vector.broadcast %54 : vector<32x1xf32> to vector<32x128xf32>
    %56 = arith.addf %53, %55 : vector<32x128xf32>
    %cst_29 = arith.constant 0.000000e+00 : f32
    %57 = vector.broadcast %cst_29 : f32 to vector<32x128xf32>
    %58 = arith.cmpf oge, %56, %57 : vector<32x128xf32>
    %cst_30 = arith.constant 0.00999999977 : f32
    %59 = vector.broadcast %cst_30 : f32 to vector<32x128xf32>
    %60 = arith.mulf %59, %56 : vector<32x128xf32>
    %61 = arith.select %58, %56, %60 : vector<32x128xi1>, vector<32x128xf32>
    %62 = vector.extract_strided_slice %1 {offsets = [0, 7], sizes = [32, 1], strides = [1, 1]} : vector<32x8xf32> to vector<32x1xf32>
    %63 = vector.broadcast %62 : vector<32x1xf32> to vector<32x128xf32>
    %64 = arith.mulf %61, %63 : vector<32x128xf32>
    %cst_31 = arith.constant dense<0.000000e+00> : vector<128xf32>
    %65 = vector.multi_reduction <add>, %64, %cst_31 [0] : vector<32x128xf32> to vector<128xf32>
    %66 = vector.shape_cast %65 : vector<128xf32> to vector<1x128xf32>
    %67 = vector.extract_strided_slice %1 {offsets = [0, 6], sizes = [1, 1], strides = [1, 1]} : vector<32x8xf32> to vector<1x1xf32>
    %68 = vector.broadcast %67 : vector<1x1xf32> to vector<1x128xf32>
    %69 = arith.addf %66, %68 : vector<1x128xf32>
    %c0_32 = arith.constant 0 : index
    %c0_33 = arith.constant 0 : index
    %70 = vector.load %arg5[%c0_32, %c0_33] : memref<1x128xf32, #tpu.memory_space<vmem>>, vector<1x128xf32>
    tpu.vector_store %arg5[%c0_32, %c0_33], %69 {strides = array<i32>} : memref<1x128xf32, #tpu.memory_space<vmem>>, vector<1x128xf32>,
    return
  }
  func.func @transform_0(%arg0: i32) -> (i32, i32) {
    %c0_i32 = arith.constant 0 : i32
    %c0_i32_0 = arith.constant 0 : i32
    return %c0_i32, %arg0 : i32, i32
  }
  func.func @transform_1(%arg0: i32) -> (i32, i32) {
    %c0_i32 = arith.constant 0 : i32
    %c0_i32_0 = arith.constant 0 : i32
    %c0_i32_1 = arith.constant 0 : i32
    return %c0_i32, %c0_i32_0 : i32, i32
  }
  func.func @transform_2(%arg0: i32) -> (i32, i32, i32) {
    %c0_i32 = arith.constant 0 : i32
    %c0_i32_0 = arith.constant 0 : i32
    %c0_i32_1 = arith.constant 0 : i32
    %c0_i32_2 = arith.constant 0 : i32
    return %c0_i32, %c0_i32_0, %c0_i32_1 : i32, i32, i32
  }
  func.func @transform_3(%arg0: i32) -> (i32, i32) {
    %c0_i32 = arith.constant 0 : i32
    %c0_i32_0 = arith.constant 0 : i32
    %c0_i32_1 = arith.constant 0 : i32
    return %c0_i32, %c0_i32_0 : i32, i32
  }
  func.func @transform_4(%arg0: i32) -> (i32, i32) {
    %c0_i32 = arith.constant 0 : i32
    %c0_i32_0 = arith.constant 0 : i32
    return %c0_i32, %arg0 : i32, i32
  }
}

</mosaic_0001>

<bundles_post_ra>
// kernel: tpu_custom_call.1
= control target key start
LH: loop header
LB: loop body
LE: loop exit
PB: predicated region body
PF: predicated region fallthrough
CT: control target
= control target key end

     0   :  { %9 = vsyncpa [#allocation4], 0  ;;  %s1274_s0 = inlined_call_operand.vmem [shape: f32[16,256], index: 0, kind: input, shape index: {}]   ;;  %s1275_s1 = inlined_call_operand.vmem [shape: f32[32,16], index: 1, kind: input, shape index: {}]   ;;  %s1276_s2 = inlined_call_operand.hbm [shape: f32[5,32,32], index: 2, kind: input, shape index: {}]   ;;  %s1277_s3 = inlined_call_operand.vmem [shape: f32[32,8], index: 3, kind: input, shape index: {}]   ;;  %s1278_s4 = inlined_call_operand.hbm [shape: f32[1,256], index: 4, kind: output, shape index: {}]  }
   0x1   :  { %10 = vsyncpa [#allocation5], 0 }
   0x2   :  { %12 = vsyncpa [#allocation5 + $0x1], 0  ;;  %s1070_s15 = smov 0   ;;  %s1072_s16 = smov 0  }
   0x3   :  { %s1074_s17 = smov 0   ;;  %s1076_s18 = smov 0  }
   0x4 LB: > { %s1091_s19 = sadd.s32 4294967295, %s1032_s18   ;;  %s814_s20 = sadd.s32 4294967294, %s1032_s18   ;;  %s1032_s18 = sphi %s1076_s18, %s1286_s18   ;;  %s1028_s17 = sphi %s1074_s17, %s1285_s17   ;;  %s1024_s16 = sphi %s1072_s16, %s1284_s16   ;;  %s1020_s15 = sphi %s1070_s15, %s1283_s15  }
   0x5   : > { %s1095_s21 = sadd.s32 1, %s1032_s18   ;;  %s25_s22 = sadd.s32 1, %s1028_s17 }
   0x6   : > { %s22_s23 = ssub.s32 %s1032_s18, %s1095_s21  ;;  %p32_p0 = scmp.ne.s32.totalorder %s1028_s17, %s1024_s16 }
   0x7   : > { %p23_p1 = scmp.eq.s32.totalorder %s22_s23, 0  ;;  %p33_p2 = scmp.eq.s32.totalorder %s1032_s18, 0 }
   0x8   : > { %p125_p3 = scmp.eq.s32.totalorder %s1091_s19, 1  ;;  %p130_p4 = scmp.ne.s32.totalorder %s1024_s16, %s1020_s15 }
   0x9   : > { %s1107_s24 = scalar_select %p23_p1, %s1028_s17, %s25_s22  }
   0xa   : > { %p1109_p5 = por %p33_p2, %p32_p0  ;;  %p1113_p6 = por %p125_p3, %p32_p0 }
   0xb   : > { %p131_p7 = scmp.eq.s32.totalorder %s814_s20, 1  ;;  %p815_p8 = scmp.ge.s32.totalorder %s1032_s18, 1 }
   0xc   : > { %p138_p9 = scmp.lt.s32.totalorder %s1032_s18, 3  ;;  %p869_p11 = scmp.eq.s32.totalorder %s1091_s19, 0 }
   0xd   : > { %p1119_p10 = por %p131_p7, %p130_p4  ;;  %s152_s5 = sshll.u32 %s1276_s2, 4  ;;  %s153_s5 = int_to_ptr.hbm [resolvable:$true] %s152_s5 }
   0xe   : > { %p1124_p12 = pnand %p815_p8, %p138_p9  ;;  %s1034_s6 = smov [#allocation3]  }
   0xf   : > { %s154_s7 = sshll.u32 %s1034_s6, 4  ;;  %s1035_s8 = smov 128   ;;  %s155_s7 = int_to_ptr.vmem [resolvable:$true] %s154_s7 }
  0x10   : > { %p861_p13 = pneg %p1124_p12  ;;  %s1036_s9 = smov 8  }
  0x11   : > { %p817_p1 = scmp.ge.s32.totalorder %s1032_s18, 2 }
  0x12   : > { %p862_p0 = pnand %p869_p11, %p861_p13 }
  0x13   : > { %167 = sbr.rel (%p817_p1) target bundleno = 30 (0x1e), region = 28 }
  0x14   : > { %864 = dma.hbm_to_vmem [thread:$0]  (!%p862_p0), %s153_s5, 2560, %s155_s7, [#allocation4], %s1035_s8, %s1035_s8, %s1036_s9  }
  0x18   : > { %170 = sbr.rel (!%p1109_p5) target bundleno = 30 (0x1e), region = 32  ;;  %s172_s10 = sand.u32 (%p1109_p5), 1, %s1028_s17  }
  0x19   : > { %s819_s11 = sshll.u32 (%p1109_p5), %s1032_s18, 3  ;;  %s818_s12 = sshll.u32 (%p1109_p5), %s172_s10, 4 }
  0x1a   : > { %s176_s20 = scalar_lea.vmem (%p1109_p5), %s1274_s0, %s819_s11  ;;  %s174_s22 = scalar_lea.vmem (%p1109_p5), [#allocation2], %s818_s12 }
  0x1b   : > { %v207_v0 = vld [vmem:[%s176_s20] sm:$0xff] (%p1109_p5)  ;;  %v209_v1 = vld [vmem:[%s176_s20 + $0x10] sm:$0xff] (%p1109_p5) }
  0x1c   : > { %208 = vst [vmem:[%s174_s22] sm:$0xff] (%p1109_p5), %v207_v0 }
  0x1d   : > { %210 = vst [vmem:[%s174_s22 + $0x8] sm:$0xff] %v209_v1 }
  0x1e PF: > { %219 = sbr.rel (%p1124_p12) target bundleno = 1024 (0x400), region = 70  ;;  %s1148_s23 = sand.u32 (!%p1124_p12), 1, %s1024_s16  }
  0x1f   : > { %s821_s25 = sshll.u32 (!%p1124_p12), %s1148_s23, 4 }
  0x20   : > { %s224_s29 = scalar_lea.vmem (!%p1124_p12), [#allocation2], %s821_s25 }
  0x23   : > { %1011 = dma.done.wait (%p869_p11), [#allocation4], 2560  }
  0x24   : > { %1013 = vsyncadd (%p869_p11), [#allocation4], 4294964736  ;;  %v1037_v2 = vmov 0   ;;  %v252_v3 = vld [vmem:[%s224_s29 + $0x8] sm:$0xff]  ;;  %v251_v4 = vld [vmem:[%s224_s29] sm:$0xff]  ;;  %vm281_vm0 = vcmask 130048   ;;  %s737_s5 = scalar_lea.hbm %s1278_s4, %s1091_s19 }
  0x25   : > { %916 = vset.pattern.permute.xlu1 %v1037_v2  ;;  %915 = vset.pattern.permute.xlu0 %v1037_v2  ;;  %v258_v5 = vld [vmem:[%s1275_s1 + $0x8] sm:$0xff]  ;;  %v1161_v6 = vld [vmem:[%s1277_s3 + $0x18] sm:$0xff]  ;;  %v257_v8 = vld [vmem:[%s1275_s1] sm:$0xff]  ;;  %v1038_v14 = vmov 1   ;;  %vm343_vm1 = vcmask 261120   ;;  %v1039_v32 = vmov 2  }
  0x26   : > { %849 = vmatpush.msra.mxu3 %v252_v3  ;;  %308 = vmatpush.msra.mxu0 %v252_v3  ;;  %v1167_v7 = vld [vmem:[%s1277_s3 + $0x8] sm:$0xff]  ;;  %v1178_v9 = vld [vmem:[%s1277_s3 + $0x10] sm:$0xff]  ;;  %v1183_v10 = vld [vmem:[%s1277_s3] sm:$0xff]  ;;  %v1040_v60 = vmov 3   ;;  %s250_s6 = scalar_lea.vmem [#allocation6], %s1148_s23  ;;  %s741_s8 = sshll.u32 %s737_s5, 4  ;;  %s742_s8 = int_to_ptr.hbm [resolvable:$true] %s741_s8 }
  0x27   : > { %278 = vperm.xlu0 %915, %v1161_v6   ;;  %268 = vperm.xlu1 %916, %v1167_v7   ;;  %v259_v11 = vld [vmem:[%s1275_s1 + $0x10] sm:$0xff]  ;;  %v260_v12 = vld [vmem:[%s1275_s1 + $0x18] sm:$0xff]  ;;  %v323_v27 = vld [vmem:[#allocation3] sm:$0xff]  ;;  %s739_s7 = sshll.u32 %s250_s6, 4  ;;  %s729_s9 = scalar_lea.sflag [#allocation5], %s1148_s23  ;;  %s740_s7 = int_to_ptr.vmem [resolvable:$true] %s739_s7 }
  0x28   : > { %850 = vmatpush.msra.mxu3 %v251_v4  ;;  %309 = vmatpush.msra.mxu0 %v251_v4  ;;  %v325_v26 = vld [vmem:[#allocation3 + $0x10] sm:$0xff]  ;;  %v326_v28 = vld [vmem:[#allocation3 + $0x18] sm:$0xff]  ;;  %v324_v29 = vld [vmem:[#allocation3 + $0x8] sm:$0xff]  ;;  %s980_s10 = sshra.s32 %s742_s8, 4  ;;  %s986_s13 = scalar_lea.hbm %s1278_s4, 2  ;;  %s981_s10 = int_to_ptr.hbm [resolvable:$true] %s980_s10 }
  0x29   : > { %824 = vmatmul.msk.f32.vlgmr.msra.gmra.mxu3 %vm281_vm0, %v258_v5  ;;  %823 = vmatmul.msk.f32.vlgmr.msra.gmra.mxu0 %vm281_vm0, %v257_v8  ;;  %v398_v50 = vld [vmem:[#allocation3 + $0x20] sm:$0xff]  ;;  %v399_v52 = vld [vmem:[#allocation3 + $0x28] sm:$0xff]  ;;  %v400_v53 = vld [vmem:[#allocation3 + $0x30] sm:$0xff]  ;;  %s982_s11 = scalar_lea.hbm %s981_s10, 1  ;;  %p987_p5 = scmp.lt.s32.totalorder %s981_s10, %s1278_s4 }
  0x2a   : > { %917 = vset.pattern.permute.xlu2 %v1038_v14  ;;  %v401_v54 = vld [vmem:[#allocation3 + $0x38] sm:$0xff]  ;;  %p983_p2 = scmp.ne.s32.totalorder %s981_s10, %s982_s11  ;;  %p988_p7 = scmp.lt.s32.totalorder %s986_s13, %s982_s11 }
  0x2b   : > { %340 = vperm.xlu2 %917, %v1161_v6  }
  0x2c   : > { %p984_p3 = pnand %p983_p2, %p1113_p6  ;;  %p989_p8 = por %p988_p7, %p987_p5 }
  0x2e   : > { %p985_p4 = pneg %p984_p3 }
  0x2f   : > { %273 = vperm.xlu0 %915, %v1178_v9   ;;  %263 = vperm.xlu1 %916, %v1183_v10  }
  0x30   : > { %p990_p9 = pnand %p989_p8, %p985_p4 }
  0x31   : > { %825 = vmatmul.msk.f32.gmra.mxu3 %vm281_vm0, %v259_v11 }
  0x33   : > { %336 = vperm.xlu2 %917, %v1178_v9  }
  0x37   : > { %919 = vset.pattern.permute.xlu1 %v1038_v14  ;;  %918 = vset.pattern.permute.xlu0 %v1038_v14 }
  0x38   : > { %328 = vperm.xlu1 %919, %v1183_v10   ;;  %332 = vperm.xlu0 %918, %v1167_v7  }
  0x39   : > { %826 = vmatmul.msk.f32.gmra.mxu3 %vm281_vm0, %v260_v12 }
  0x3b   : > { %920 = vset.pattern.permute.xlu2 %v1039_v32 }
  0x3c   : > { %415 = vperm.xlu2 %920, %v1161_v6  }
  0x40   : > { %922 = vset.pattern.permute.xlu0 %v1039_v32  ;;  %921 = vset.pattern.permute.xlu1 %v1039_v32 }
  0x41   : > { %403 = vperm.xlu0 %922, %v1183_v10   ;;  %411 = vperm.xlu1 %921, %v1178_v9  }
  0x44   : > { %407 = vperm.xlu2 %920, %v1167_v7  }
  0x49   : > { %923 = vset.pattern.permute.xlu1 %v1040_v60 }
  0x4a   : > { %489 = vperm.xlu1 %923, %v1161_v6  }
  0x4c   : > { %924 = vset.pattern.permute.xlu2 %v1040_v60 }
  0x4d   : > { %485 = vperm.xlu2 %924, %v1178_v9  }
  0x52   : > { %481 = vperm.xlu1 %923, %v1167_v7  }
  0x55   : > { %477 = vperm.xlu2 %924, %v1183_v10  }
  0x85   : > { %v341_v30 = vpop.permute.xlu2 %340 }
  0x8d   : > { %v337_v34 = vpop.permute.xlu2 %336 }
  0x96   : > { %v416_v57 = vpop.permute.xlu2 %415 }
  0x99   : > { %v279_v15 = vpop.permute.xlu0 %278  ;;  %v269_v17 = vpop.permute.xlu1 %268 }
  0x9e   : > { %v408_v61 = vpop.permute.xlu2 %407 }
  0xa1   : > { %v274_v18 = vpop.permute.xlu0 %273  ;;  %v264_v22 = vpop.permute.xlu1 %263 }
  0xa6   : > { %v311_v23 = vpop.f32.mrf.mxu0 }
  0xa7   : > { %v312_v25 = vadd.f32 %v311_v23, %v264_v22 }
  0xaa   : > { %v333_v35 = vpop.permute.xlu0 %332  ;;  %v329_v38 = vpop.permute.xlu1 %328 }
  0xac   : > { %v314_v13 = vpop.f32.mrf.mxu3 }
  0xad   : > { %v315_v24 = vadd.f32 %v314_v13, %v269_v17  ;;  %v473_v17 = vld [vmem:[#allocation3 + $0x48] sm:$0xff] }
  0xb3   : > { %v412_v59 = vpop.permute.xlu1 %411  ;;  %v404_v63 = vpop.permute.xlu0 %403 }
  0xb4   : > { %v317_v16 = vpop.f32.mrf.mxu3 }
  0xb5   : > { %v318_v21 = vadd.f32 %v317_v16, %v274_v18  ;;  %v474_v18 = vld [vmem:[#allocation3 + $0x50] sm:$0xff] }
  0xbc   : > { %v320_v19 = vpop.f32.mrf.mxu3  ;;  %v490_v23 = vpop.permute.xlu1 %489 }
  0xbd   : > { %v321_v20 = vadd.f32 %v320_v19, %v279_v15  ;;  %v472_v15 = vld [vmem:[#allocation3 + $0x40] sm:$0xff]  ;;  %v475_v19 = vld [vmem:[#allocation3 + $0x58] sm:$0xff] }
  0xbf   : > { %368 = vmatpush.msra.mxu1 %v321_v20  ;;  %851 = vmatpush.msra.mxu2 %v321_v20 }
  0xc1   : > { %369 = vmatpush.msra.mxu1 %v318_v21  ;;  %852 = vmatpush.msra.mxu2 %v318_v21  ;;  %v1041_v21 = vmov 4  }
  0xc2   : > { %926 = vset.pattern.permute.xlu1 %v1041_v21  ;;  %925 = vset.pattern.permute.xlu0 %v1041_v21 }
  0xc3   : > { %370 = vmatpush.msra.mxu1 %v315_v24  ;;  %853 = vmatpush.msra.mxu2 %v315_v24  ;;  %v486_v24 = vpop.permute.xlu2 %485 }
  0xc4   : > { %559 = vperm.xlu1 %926, %v1178_v9   ;;  %563 = vperm.xlu0 %925, %v1161_v6  }
  0xc5   : > { %371 = vmatpush.msra.mxu1 %v312_v25  ;;  %854 = vmatpush.msra.mxu2 %v312_v25 }
  0xc6   : > { %829 = vmatmul.msk.f32.vlgmr.msra.gmra.mxu2 %vm343_vm1, %v325_v26  ;;  %827 = vmatmul.msk.f32.vlgmr.msra.gmra.mxu1 %vm343_vm1, %v323_v27  ;;  %v482_v26 = vpop.permute.xlu1 %481 }
  0xc7   : > { %927 = vset.pattern.permute.xlu2 %v1041_v21 }
  0xc8   : > { %555 = vperm.xlu2 %927, %v1167_v7  }
  0xcc   : > { %551 = vperm.xlu1 %926, %v1183_v10  }
  0xce   : > { %830 = vmatmul.msk.f32.gmra.mxu2 %vm343_vm1, %v326_v28  ;;  %828 = vmatmul.msk.f32.gmra.mxu1 %vm343_vm1, %v324_v29  ;;  %v478_v28 = vpop.permute.xlu2 %477 }
 0x143   : > { %v373_v31 = vpop.f32.mrf.mxu1 }
 0x144   : > { %v374_v42 = vadd.f32 %v373_v31, %v329_v38 }
 0x146   : > { %v389_v48 = vmul.f32 0.01, %v374_v42  ;;  %vm385_vm5 = vcmp.ge.f32.partialorder %v374_v42, 0.0 }
 0x148   : > { %v393_v51 = vsel %vm385_vm5, %v374_v42, %v389_v48  ;;  %v547_v42 = vld [vmem:[#allocation3 + $0x68] sm:$0xff]  ;;  %v560_v48 = vpop.permute.xlu1 %559 }
 0x149   : > { %v379_v33 = vpop.f32.mrf.mxu2 }
 0x14a   : > { %v380_v37 = vadd.f32 %v379_v33, %v337_v34 }
 0x14b   : > { %v376_v36 = vpop.f32.mrf.mxu1 }
 0x14c   : > { %v377_v41 = vadd.f32 %v376_v36, %v333_v35  ;;  %v391_v44 = vmul.f32 0.01, %v380_v37  ;;  %vm387_vm3 = vcmp.ge.f32.partialorder %v380_v37, 0.0 }
 0x14e   : > { %v390_v46 = vmul.f32 0.01, %v377_v41  ;;  %vm386_vm4 = vcmp.ge.f32.partialorder %v377_v41, 0.0  ;;  %v395_v47 = vsel %vm387_vm3, %v380_v37, %v391_v44  ;;  %v549_v44 = vld [vmem:[#allocation3 + $0x78] sm:$0xff] }
 0x150   : > { %v394_v49 = vsel %vm386_vm4, %v377_v41, %v390_v46 }
 0x151   : > { %v382_v39 = vpop.f32.mrf.mxu2 }
 0x152   : > { %v383_v40 = vadd.f32 %v382_v39, %v341_v30 }
 0x154   : > { %vm388_vm2 = vcmp.ge.f32.partialorder %v383_v40, 0.0  ;;  %v392_v43 = vmul.f32 0.01, %v383_v40 }
 0x156   : > { %v396_v45 = vsel %vm388_vm2, %v383_v40, %v392_v43  ;;  %v546_v40 = vld [vmem:[#allocation3 + $0x60] sm:$0xff]  ;;  %v548_v43 = vld [vmem:[#allocation3 + $0x70] sm:$0xff] }
 0x157   : > { %442 = vmatpush.msrb.mxu2 %v396_v45 }
 0x159   : > { %443 = vmatpush.msrb.mxu2 %v395_v47  ;;  %v1042_v47 = vmov 5  }
 0x15a   : > { %930 = vset.pattern.permute.xlu1 %v1042_v47  ;;  %929 = vset.pattern.permute.xlu0 %v1042_v47 }
 0x15b   : > { %444 = vmatpush.msrb.mxu2 %v394_v49  ;;  %633 = vperm.xlu1 %930, %v1178_v9  }
 0x15c   : > { %629 = vperm.xlu0 %929, %v1167_v7   ;;  %928 = vset.pattern.permute.xlu2 %v1042_v47 }
 0x15d   : > { %445 = vmatpush.msrb.mxu2 %v393_v51  ;;  %625 = vperm.xlu2 %928, %v1183_v10   ;;  %v556_v51 = vpop.permute.xlu2 %555 }
 0x15e   : > { %831 = vmatmul.msk.f32.vlgmr.msrb.gmra.mxu2 %vm343_vm1, %v398_v50  ;;  %v1043_v50 = vmov 7  }
 0x163   : > { %931 = vset.pattern.permute.xlu1 %v1043_v50 }
 0x164   : > { %933 = vset.pattern.permute.xlu0 %v1043_v50  ;;  %694 = vperm.xlu1 %931, %v1183_v10  }
 0x165   : > { %702 = vperm.xlu0 %933, %v1178_v9   ;;  %637 = vperm.xlu2 %928, %v1161_v6  }
 0x166   : > { %832 = vmatmul.msk.f32.gmra.mxu2 %vm343_vm1, %v399_v52  ;;  %v564_v52 = vpop.permute.xlu0 %563 }
 0x16c   : > { %706 = vperm.xlu1 %931, %v1161_v6   ;;  %v621_v6 = vld [vmem:[#allocation3 + $0x88] sm:$0xff] }
 0x16d   : > { %932 = vset.pattern.permute.xlu2 %v1043_v50 }
 0x16e   : > { %833 = vmatmul.msk.f32.gmra.mxu2 %vm343_vm1, %v400_v53  ;;  %698 = vperm.xlu2 %932, %v1167_v7   ;;  %v623_v7 = vld [vmem:[#allocation3 + $0x98] sm:$0xff] }
 0x176   : > { %834 = vmatmul.msk.f32.gmra.mxu2 %vm343_vm1, %v401_v54  ;;  %v552_v54 = vpop.permute.xlu1 %551 }
 0x1e1   : > { %v447_v55 = vpop.f32.mrf.mxu2 }
 0x1e2   : > { %v448_v3 = vadd.f32 %v447_v55, %v404_v63 }
 0x1e4   : > { %v463_v13 = vmul.f32 0.01, %v448_v3  ;;  %vm459_vm9 = vcmp.ge.f32.partialorder %v448_v3, 0.0 }
 0x1e6   : > { %v467_v16 = vsel %vm459_vm9, %v448_v3, %v463_v13 }
 0x1e9   : > { %v450_v56 = vpop.f32.mrf.mxu2 }
 0x1ea   : > { %v451_v1 = vadd.f32 %v450_v56, %v408_v61 }
 0x1ec   : > { %v464_v11 = vmul.f32 0.01, %v451_v1  ;;  %vm460_vm8 = vcmp.ge.f32.partialorder %v451_v1, 0.0 }
 0x1ee   : > { %v468_v14 = vsel %vm460_vm8, %v451_v1, %v464_v11 }
 0x1f1   : > { %v453_v58 = vpop.f32.mrf.mxu2 }
 0x1f2   : > { %v454_v62 = vadd.f32 %v453_v58, %v412_v59 }
 0x1f4   : > { %v465_v5 = vmul.f32 0.01, %v454_v62  ;;  %vm461_vm7 = vcmp.ge.f32.partialorder %v454_v62, 0.0 }
 0x1f6   : > { %v469_v12 = vsel %vm461_vm7, %v454_v62, %v465_v5 }
 0x1f9   : > { %v456_v0 = vpop.f32.mrf.mxu2 }
 0x1fa   : > { %v457_v2 = vadd.f32 %v456_v0, %v416_v57  ;;  %v1044_v0 = vmov 6  }
 0x1fb   : > { %935 = vset.pattern.permute.xlu0 %v1044_v0  ;;  %934 = vset.pattern.permute.xlu2 %v1044_v0 }
 0x1fc   : > { %vm462_vm6 = vcmp.ge.f32.partialorder %v457_v2, 0.0  ;;  %v466_v4 = vmul.f32 0.01, %v457_v2  ;;  %723 = vperm.xlu2 %934, %v1183_v10  }
 0x1fe   : > { %v470_v8 = vsel %vm462_vm6, %v457_v2, %v466_v4  ;;  %v620_v2 = vld [vmem:[#allocation3 + $0x80] sm:$0xff]  ;;  %v622_v4 = vld [vmem:[#allocation3 + $0x90] sm:$0xff] }
 0x1ff   : > { %516 = vmatpush.msrb.mxu3 %v470_v8  ;;  %v626_v8 = vpop.permute.xlu2 %625 }
 0x201   : > { %517 = vmatpush.msrb.mxu3 %v469_v12  ;;  %v630_v12 = vpop.permute.xlu0 %629 }
 0x203   : > { %518 = vmatpush.msrb.mxu3 %v468_v14  ;;  %v634_v14 = vpop.permute.xlu1 %633 }
 0x205   : > { %519 = vmatpush.msrb.mxu3 %v467_v16 }
 0x206   : > { %835 = vmatmul.msk.f32.vlgmr.msrb.gmra.mxu3 %vm343_vm1, %v472_v15 }
 0x207   : > { %v638_v13 = vpop.permute.xlu2 %637 }
 0x20e   : > { %836 = vmatmul.msk.f32.gmra.mxu3 %vm343_vm1, %v473_v17 }
 0x20f   : > { %v699_v21 = vpop.permute.xlu2 %698 }
 0x216   : > { %837 = vmatmul.msk.f32.gmra.mxu3 %vm343_vm1, %v474_v18 }
 0x21e   : > { %838 = vmatmul.msk.f32.gmra.mxu3 %vm343_vm1, %v475_v19 }
 0x289   : > { %v521_v20 = vpop.f32.mrf.mxu3 }
 0x28a   : > { %v522_v32 = vadd.f32 %v521_v20, %v478_v28 }
 0x28c   : > { %v537_v38 = vmul.f32 0.01, %v522_v32  ;;  %vm533_vm13 = vcmp.ge.f32.partialorder %v522_v32, 0.0 }
 0x28e   : > { %v541_v41 = vsel %vm533_vm13, %v522_v32, %v537_v38 }
 0x291   : > { %v524_v22 = vpop.f32.mrf.mxu3 }
 0x292   : > { %v525_v30 = vadd.f32 %v524_v22, %v482_v26 }
 0x294   : > { %v538_v36 = vmul.f32 0.01, %v525_v30  ;;  %vm534_vm12 = vcmp.ge.f32.partialorder %v525_v30, 0.0 }
 0x296   : > { %v542_v39 = vsel %vm534_vm12, %v525_v30, %v538_v36 }
 0x299   : > { %v527_v25 = vpop.f32.mrf.mxu3 }
 0x29a   : > { %v528_v27 = vadd.f32 %v527_v25, %v486_v24  ;;  %v703_v25 = vpop.permute.xlu0 %702 }
 0x29c   : > { %v539_v34 = vmul.f32 0.01, %v528_v27  ;;  %vm535_vm11 = vcmp.ge.f32.partialorder %v528_v27, 0.0 }
 0x29e   : > { %v543_v37 = vsel %vm535_vm11, %v528_v27, %v539_v34 }
 0x2a1   : > { %v530_v29 = vpop.f32.mrf.mxu3 }
 0x2a2   : > { %v531_v31 = vadd.f32 %v530_v29, %v490_v23  ;;  %v695_v23 = vpop.permute.xlu1 %694 }
 0x2a4   : > { %vm536_vm10 = vcmp.ge.f32.partialorder %v531_v31, 0.0  ;;  %v540_v33 = vmul.f32 0.01, %v531_v31 }
 0x2a6   : > { %v544_v35 = vsel %vm536_vm10, %v531_v31, %v540_v33 }
 0x2a7   : > { %590 = vmatpush.msrb.mxu0 %v544_v35 }
 0x2a9   : > { %591 = vmatpush.msrb.mxu0 %v543_v37 }
 0x2aa   : > { %v707_v34 = vpop.permute.xlu1 %706 }
 0x2ab   : > { %592 = vmatpush.msrb.mxu0 %v542_v39 }
 0x2ad   : > { %593 = vmatpush.msrb.mxu0 %v541_v41 }
 0x2ae   : > { %839 = vmatmul.msk.f32.vlgmr.msrb.gmra.mxu0 %vm343_vm1, %v546_v40 }
 0x2b6   : > { %840 = vmatmul.msk.f32.gmra.mxu0 %vm343_vm1, %v547_v42 }
 0x2be   : > { %841 = vmatmul.msk.f32.gmra.mxu0 %vm343_vm1, %v548_v43 }
 0x2c6   : > { %842 = vmatmul.msk.f32.gmra.mxu0 %vm343_vm1, %v549_v44  ;;  %v724_v44 = vpop.permute.xlu2 %723 }
 0x32b   : > { %v595_v45 = vpop.f32.mrf.mxu0 }
 0x32c   : > { %v596_v58 = vadd.f32 %v595_v45, %v552_v54 }
 0x32e   : > { %v611_v63 = vmul.f32 0.01, %v596_v58  ;;  %vm607_vm2 = vcmp.ge.f32.partialorder %v596_v58, 0.0 }
 0x330   : > { %v615_v3 = vsel %vm607_vm2, %v596_v58, %v611_v63 }
 0x333   : > { %v598_v46 = vpop.f32.mrf.mxu0 }
 0x334   : > { %v599_v56 = vadd.f32 %v598_v46, %v556_v51 }
 0x336   : > { %v612_v62 = vmul.f32 0.01, %v599_v56  ;;  %vm608_vm0 = vcmp.ge.f32.partialorder %v599_v56, 0.0 }
 0x338   : > { %v616_v1 = vsel %vm608_vm0, %v599_v56, %v612_v62 }
 0x33b   : > { %v601_v49 = vpop.f32.mrf.mxu0 }
 0x33c   : > { %v602_v53 = vadd.f32 %v601_v49, %v560_v48 }
 0x33e   : > { %v613_v60 = vmul.f32 0.01, %v602_v53  ;;  %vm609_vm15 = vcmp.ge.f32.partialorder %v602_v53, 0.0 }
 0x340   : > { %v617_v9 = vsel %vm609_vm15, %v602_v53, %v613_v60 }
 0x343   : > { %v604_v55 = vpop.f32.mrf.mxu0 }
 0x344   : > { %v605_v57 = vadd.f32 %v604_v55, %v564_v52 }
 0x346   : > { %vm610_vm14 = vcmp.ge.f32.partialorder %v605_v57, 0.0  ;;  %v614_v59 = vmul.f32 0.01, %v605_v57 }
 0x348   : > { %v618_v61 = vsel %vm610_vm14, %v605_v57, %v614_v59 }
 0x349   : > { %664 = vmatpush.msrb.mxu1 %v618_v61 }
 0x34b   : > { %665 = vmatpush.msrb.mxu1 %v617_v9 }
 0x34d   : > { %666 = vmatpush.msrb.mxu1 %v616_v1 }
 0x34f   : > { %667 = vmatpush.msrb.mxu1 %v615_v3 }
 0x350   : > { %843 = vmatmul.msk.f32.vlgmr.msrb.gmra.mxu1 %vm343_vm1, %v620_v2 }
 0x358   : > { %844 = vmatmul.msk.f32.gmra.mxu1 %vm343_vm1, %v621_v6 }
 0x360   : > { %845 = vmatmul.msk.f32.gmra.mxu1 %vm343_vm1, %v622_v4 }
 0x368   : > { %846 = vmatmul.msk.f32.gmra.mxu1 %vm343_vm1, %v623_v7 }
 0x3cd   : > { %v669_v5 = vpop.f32.mrf.mxu1 }
 0x3ce   : > { %v670_v16 = vadd.f32 %v669_v5, %v626_v8 }
 0x3d0   : > { %v685_v19 = vmul.f32 0.01, %v670_v16  ;;  %vm681_vm4 = vcmp.ge.f32.partialorder %v670_v16, 0.0 }
 0x3d2   : > { %v689_v24 = vsel %vm681_vm4, %v670_v16, %v685_v19 }
 0x3d3   : > { %v709_v30 = vmul.f32 %v695_v23, %v689_v24 }
 0x3d5   : > { %v672_v11 = vpop.f32.mrf.mxu1 }
 0x3d6   : > { %v673_v15 = vadd.f32 %v672_v11, %v630_v12 }
 0x3d8   : > { %v686_v18 = vmul.f32 0.01, %v673_v15  ;;  %vm682_vm3 = vcmp.ge.f32.partialorder %v673_v15, 0.0 }
 0x3da   : > { %v690_v22 = vsel %vm682_vm3, %v673_v15, %v686_v18 }
 0x3db   : > { %v710_v27 = vmul.f32 %v699_v21, %v690_v22 }
 0x3dd   : > { %v675_v17 = vpop.f32.mrf.mxu1  ;;  %v713_v33 = vadd.f32 %v710_v27, %v709_v30 }
 0x3de   : > { %v676_v10 = vadd.f32 %v675_v17, %v634_v14 }
 0x3e0   : > { %v687_v20 = vmul.f32 0.01, %v676_v10  ;;  %vm683_vm5 = vcmp.ge.f32.partialorder %v676_v10, 0.0 }
 0x3e2   : > { %v691_v26 = vsel %vm683_vm5, %v676_v10, %v687_v20 }
 0x3e3   : > { %v711_v31 = vmul.f32 %v703_v25, %v691_v26 }
 0x3e5   : > { %v678_v28 = vpop.f32.mrf.mxu1  ;;  %v714_v36 = vadd.f32 %v713_v33, %v711_v31 }
 0x3e6   : > { %v679_v29 = vadd.f32 %v678_v28, %v638_v13 }
 0x3e8   : > { %v688_v32 = vmul.f32 0.01, %v679_v29  ;;  %vm684_vm1 = vcmp.ge.f32.partialorder %v679_v29, 0.0 }
 0x3ea   : > { %v692_v35 = vsel %vm684_vm1, %v679_v29, %v688_v32 }
 0x3eb   : > { %v712_v37 = vmul.f32 %v707_v34, %v692_v35 }
 0x3ed   : > { %v715_v38 = vadd.f32 %v714_v36, %v712_v37 }
 0x3ef   : > { %v716_v39 = vrot.slane %v715_v38, 4 }
 0x3f1   : > { %v717_v40 = vadd.f32 %v716_v39, %v715_v38 }
 0x3f3   : > { %v718_v41 = vrot.slane %v717_v40, 2 }
 0x3f5   : > { %v719_v42 = vadd.f32 %v718_v41, %v717_v40 }
 0x3f7   : > { %v720_v43 = vrot.slane %v719_v42, 1 }
 0x3f9   : > { %v721_v45 = vadd.f32 %v720_v43, %v719_v42 }
 0x3fb   : > { %v726_v46 = vadd.f32 %v724_v44, %v721_v45 }
 0x3fd   : > { %727 = vst [vmem:[%s250_s6] sm:$0x1] %v726_v46 }
 0x3fe   : > { %993 = shalt.err (!%p990_p9)
}
 0x3ff   : > { %859 = dma.vmem_to_hbm [thread:$0]  (%p1113_p6), %s740_s7, 16, %s742_s8, %s729_s9  }
 0x400 PF: > { %s753_s23 = sand.u32 1, %s1020_s15   ;;  %p866_p11 = pnand %p817_p1, %p1119_p10 }
 0x401   : > { %s754_s22 = scalar_lea.sflag [#allocation5], %s753_s23 }
 0x402   : > { %p867_p12 = pneg %p866_p11 }
 0x404   : > { %1015 = dma.done.wait (%p867_p12), %s754_s22, 16  }
 0x405   : > { %1017 = vsyncadd (%p867_p12), %s754_s22, 4294967280  ;;  %p15_p13 = scmp.ge.s32.totalorder %s1095_s21, 4   ;;  %s1283_s15 = smov %s1024_s16 }
 0x406   : > { %s1284_s16 = smov %s1028_s17  ;;  %s1285_s17 = smov %s1107_s24 }
 0x407   : > { %s1286_s18 = smov %s1095_s21  ;;  %17 = sbr.rel (!%p15_p13) target bundleno = 4 (0x4), region = 123 }
 0x40c   :  { %759 = vsyncpa [#allocation4], 1 }
 0x40d   :  { %761 = vsyncpa [#allocation4 + $0x1], 1 }
 0x40e   :  { %762 = vsyncpa [#allocation5], 1 }
 0x40f   :  { %764 = vsyncpa [#allocation5 + $0x1], 1 }

</bundles_post_ra>
